<compile_context>
chip_gen: v7x
topology: tpu7x:2x2x1
jax: 0.10.0
libtpu: 0.0.40
codegen_flags: <defaults>
</compile_context>

<pallas_src>
import jax
import jax.numpy as jnp
import numpy as np
from jax import lax
from jax.experimental import pallas as pl
from jax.experimental.pallas import tpu as pltpu

RMS_EPS = 1.1920928955078125e-07  # torch.finfo(float32).eps (nn.RMSNorm eps=None default)


def _make_cnn_block_kernel(Wp, Nq, with_scale_shift):
    """Build the kernel body; Wp / Nq are Python-int closure constants."""

    def kernel(x_ref, w_ref, b_ref, g_ref, m_ref, mt_ref, *rest):
        # x_ref : (Cin, NIN)   flattened zero-padded image (row stride Wp), bf16/f32
        # w_ref : (9, Cout, Cin) conv weight, tap-major (d = ky*3 + kx)
        # b_ref : (Cout, 1)    conv bias (f32)
        # g_ref : (1, Nq)      RMSNorm weight along flattened spatial axis
        #                      (gamma[w] at lane h*Wp + w, 0 on the padded columns)
        # m_ref : (Nq, H)      selector, 1/W where lane belongs to row h and w < W
        # mt_ref: (H, Nq)      0/1 selector transpose (broadcast stats back to lanes)
        # sc_ref: (Cout, 1)    (1 + scale) per batch   [only if with_scale_shift]
        # sh_ref: (Cout, 1)    shift per batch         [only if with_scale_shift]
        # o_ref : (Cout, Nq)   NCHW-ordered output, flattened spatial (Wp row stride)
        if with_scale_shift:
            sc_ref, sh_ref, o_ref = rest
        else:
            (o_ref,) = rest

        x = x_ref[...]  # single VMEM load of the padded image

        # 3x3 conv as 9 accumulating MXU matmuls; tap (ky, kx) is a static lane-offset
        # slice of the flattened padded image.  f32 accumulation on the MXU.
        acc = None
        for d in range(9):
            ky, kx = divmod(d, 3)
            off = ky * Wp + kx
            a = x[:, off:off + Nq]                                   # (Cin, Nq)
            p = jnp.dot(w_ref[d], a, preferred_element_type=jnp.float32)
            acc = p if acc is None else acc + p                      # (Cout, Nq) f32

        y = acc + b_ref[...]                                         # conv bias

        # RMSNorm over the PyTorch last dim (= W): segmented lane reduction done on the
        # MXU with the precomputed selectors (no reshape / lane gathers in the kernel).
        ms = jnp.dot(y * y, m_ref[...], preferred_element_type=jnp.float32)    # (Cout, H)
        inv = lax.rsqrt(ms + jnp.float32(RMS_EPS))
        inv_b = jnp.dot(inv, mt_ref[...], preferred_element_type=jnp.float32)  # (Cout, Nq)
        y = y * inv_b * g_ref[...]

        if with_scale_shift:
            y = y * sc_ref[...] + sh_ref[...]                        # x*(1+scale)+shift

        # ReLU; Dropout is identity in eval mode.
        # TODO(synk): training-mode dropout (pltpu.prng_seed + pltpu.prng_random_bits).
        o_ref[...] = jnp.maximum(y, 0.0).astype(o_ref.dtype)

    return kernel


def _padded_block_bytes(shape, dtype):
    """VMEM footprint of one block including (sublane, lane) tile padding."""
    itemsize = jnp.dtype(dtype).itemsize
    shape = tuple(shape)
    lead = int(np.prod(shape[:-2])) if len(shape) > 2 else 1
    sub_mult = max(8, 32 // itemsize)
    sub = -(-shape[-2] // sub_mult) * sub_mult
    lane = -(-shape[-1] // 128) * 128
    return lead * sub * lane * itemsize


def cnn_block_forward(x_nchw, conv_w, conv_b, rms_w, scale_shift=None, *,
                      matmul_dtype=jnp.bfloat16):
    """CNNBlock forward (eval mode). x_nchw: (B, Cin, H, W) f32 -> (B, Cout, H, W) f32."""
    B, Cin, H, W = x_nchw.shape
    Cout = conv_w.shape[0]
    assert W == Cout, "nn.RMSNorm(out_channels) on NCHW input requires W == out_channels"

    Wp = W + 2                  # padded row width (1 zero column each side)
    Nq = H * Wp                 # flattened output positions (W valid + 2 pad cols / row)
    NIN = (H + 3) * Wp          # flattened padded input (1 top pad row, 2 bottom pad rows)

    # ---- wrapper prep: one cast+pad of the activations, tiny constant tables ---------
    xpad = jnp.pad(x_nchw.astype(matmul_dtype), ((0, 0), (0, 0), (1, 2), (1, 1)))
    xflat = xpad.reshape(B, Cin, NIN)          # free reshape, stays channel-major

    # (Cout, Cin, 3, 3) -> (9, Cout, Cin); tap index d = ky*3 + kx matches the kernel.
    w9 = jnp.transpose(conv_w, (2, 3, 0, 1)).reshape(9, Cout, Cin).astype(matmul_dtype)
    bias = conv_b.reshape(Cout, 1).astype(jnp.float32)

    cols = jnp.arange(Nq, dtype=jnp.int32) % Wp
    rows = jnp.arange(Nq, dtype=jnp.int32) // Wp
    gamma_flat = jnp.where(
        cols < W, rms_w.astype(jnp.float32)[jnp.minimum(cols, W - 1)], 0.0
    ).reshape(1, Nq)
    sel = ((rows[:, None] == jnp.arange(H, dtype=jnp.int32)[None, :])
           & (cols[:, None] < W)).astype(jnp.float32)                 # (Nq, H) 0/1
    m_sel = sel / jnp.float32(W)                                      # segment mean
    mt_sel = sel.T                                                    # (H, Nq) 0/1

    with_ss = scale_shift is not None
    in_specs = [
        pl.BlockSpec((None, Cin, NIN), lambda b: (b, 0, 0)),
        pl.BlockSpec((9, Cout, Cin), lambda b: (0, 0, 0)),
        pl.BlockSpec((Cout, 1), lambda b: (0, 0)),
        pl.BlockSpec((1, Nq), lambda b: (0, 0)),
        pl.BlockSpec((Nq, H), lambda b: (0, 0)),
        pl.BlockSpec((H, Nq), lambda b: (0, 0)),
    ]
    args = [xflat, w9, bias, gamma_flat, m_sel, mt_sel]
    if with_ss:
        scale, shift = scale_shift
        sc = (1.0 + scale.reshape(B, Cout, 1)).astype(jnp.float32)    # fold the +1 here
        sh = shift.reshape(B, Cout, 1).astype(jnp.float32)
        in_specs += [pl.BlockSpec((None, Cout, 1), lambda b: (b, 0, 0)),
                     pl.BlockSpec((None, Cout, 1), lambda b: (b, 0, 0))]
        args += [sc, sh]

    # VMEM budget: padded block sizes, x2 double-buffer per pipelined spec, plus an
    # allowance for epilogue temporaries; clamped to <= 48 MiB (v7x headroom).
    blocks = [((Cin, NIN), matmul_dtype), ((9, Cout, Cin), matmul_dtype),
              ((Cout, 1), jnp.float32), ((1, Nq), jnp.float32),
              ((Nq, H), jnp.float32), ((H, Nq), jnp.float32),
              ((Cout, Nq), jnp.float32)]
    if with_ss:
        blocks += [((Cout, 1), jnp.float32)] * 2
    per_step = sum(_padded_block_bytes(s, d) for s, d in blocks)
    out_block = _padded_block_bytes((Cout, Nq), jnp.float32)
    vmem_limit = int(min(48 * 2 ** 20, max(16 * 2 ** 20, 2 * per_step + 8 * out_block)))

    kernel = _make_cnn_block_kernel(Wp, Nq, with_ss)
    out_flat = pl.pallas_call(
        kernel,
        out_shape=jax.ShapeDtypeStruct((B, Cout, Nq), jnp.float32),
        grid_spec=pltpu.PrefetchScalarGridSpec(
            num_scalar_prefetch=0,
            grid=(B,),   # one image per step; "parallel" -> split across v7x cores
            in_specs=in_specs,
            out_specs=pl.BlockSpec((None, Cout, Nq), lambda b: (b, 0, 0)),
        ),
        compiler_params=pltpu.CompilerParams(
            dimension_semantics=("parallel",),
            vmem_limit_bytes=vmem_limit,
        ),
    )(*args)

    # Output is already NCHW-ordered; free reshape + one cheap slice drops the two
    # padded columns per row.  (No transpose anywhere on the activation path.)
    return out_flat.reshape(B, Cout, H, Wp)[:, :, :, :W]


def cnn_block_reference(x, conv_w, conv_b, rms_w, scale_shift=None):
    """Pure-JAX reference mirroring the PyTorch forward (eval mode)."""
    y = lax.conv_general_dilated(x, conv_w, window_strides=(1, 1), padding="SAME",
                                 dimension_numbers=("NCHW", "OIHW", "NCHW"))
    y = y + conv_b.reshape(1, -1, 1, 1)
    ms = jnp.mean(y * y, axis=-1, keepdims=True)
    y = y * lax.rsqrt(ms + jnp.float32(RMS_EPS)) * rms_w  # weight broadcasts along W
    if scale_shift is not None:
        scale, shift = scale_shift
        y = y * (1.0 + scale.reshape(y.shape[0], -1, 1, 1)) + shift.reshape(y.shape[0], -1, 1, 1)
    return jnp.maximum(y, 0.0)  # dropout is identity in eval mode


if __name__ == "__main__":
    B, Cin, Cout, H, W = 2, 4, 16, 16, 16  # W must equal Cout (see note above)

    key = jax.random.PRNGKey(0)
    k_x, k_w, k_b, k_g, k_sc, k_sh = jax.random.split(key, 6)

    x = jax.random.normal(k_x, (B, Cin, H, W), jnp.float32)
    conv_w = 0.1 * jax.random.normal(k_w, (Cout, Cin, 3, 3), jnp.float32)
    conv_b = 0.1 * jax.random.normal(k_b, (Cout,), jnp.float32)
    rms_w = 1.0 + 0.1 * jax.random.normal(k_g, (Cout,), jnp.float32)
    scale = 0.1 * jax.random.normal(k_sc, (B, Cout, 1, 1), jnp.float32)
    shift = 0.1 * jax.random.normal(k_sh, (B, Cout, 1, 1), jnp.float32)

    ref0 = jax.block_until_ready(cnn_block_reference(x, conv_w, conv_b, rms_w, None))
    ref1 = jax.block_until_ready(cnn_block_reference(x, conv_w, conv_b, rms_w, (scale, shift)))

    # Path 1: default bf16 matmul inputs (f32 accumulate + f32 epilogue), no scale/shift.
    out0 = jax.block_until_ready(cnn_block_forward(x, conv_w, conv_b, rms_w, None))
    np.testing.assert_allclose(np.asarray(out0), np.asarray(ref0), rtol=5e-2, atol=5e-2)

    # Path 2: default bf16 matmul inputs, with scale/shift.
    out1 = jax.block_until_ready(cnn_block_forward(x, conv_w, conv_b, rms_w, (scale, shift)))
    np.testing.assert_allclose(np.asarray(out1), np.asarray(ref1), rtol=5e-2, atol=5e-2)

    # Path 3: f32 matmul inputs for tight numerics (optional slower path).
    out2 = jax.block_until_ready(
        cnn_block_forward(x, conv_w, conv_b, rms_w, (scale, shift), matmul_dtype=jnp.float32))
    np.testing.assert_allclose(np.asarray(out2), np.asarray(ref1), rtol=1e-4, atol=1e-4)

    print("KERNEL_OK")
</pallas_src>

<mosaic_0001>
module attributes {stable_mosaic.version = 11 : i64} {
  func.func @kernel(%arg0: i32, %arg1: memref<1x4x342xbf16, #tpu.memory_space<vmem>>, %arg2: memref<9x16x4xbf16, #tpu.memory_space<vmem>>, %arg3: memref<16x1xf32, #tpu.memory_space<vmem>>, %arg4: memref<1x288xf32, #tpu.memory_space<vmem>>, %arg5: memref<288x16xf32, #tpu.memory_space<vmem>>, %arg6: memref<16x288xf32, #tpu.memory_space<vmem>>, %arg7: memref<1x16x288xf32, #tpu.memory_space<vmem>>) attributes {dimension_semantics = [#tpu.dimension_semantics<parallel>], iteration_bounds = array<i64: 2>, scalar_prefetch = 0 : i64, scratch_operands = 0 : i64, tpu.core_type = #tpu.core_type<tc>, window_params = [{transform_indices = @transform_0, window_bounds = array<i64: 1, 4, 342>}, {pipeline_mode = #tpu.pipeline_mode<synchronous>, transform_indices = @transform_1, window_bounds = array<i64: 9, 16, 4>}, {pipeline_mode = #tpu.pipeline_mode<synchronous>, transform_indices = @transform_2, window_bounds = array<i64: 16, 1>}, {pipeline_mode = #tpu.pipeline_mode<synchronous>, transform_indices = @transform_3, window_bounds = array<i64: 1, 288>}, {pipeline_mode = #tpu.pipeline_mode<synchronous>, transform_indices = @transform_4, window_bounds = array<i64: 288, 16>}, {pipeline_mode = #tpu.pipeline_mode<synchronous>, transform_indices = @transform_5, window_bounds = array<i64: 16, 288>}, {transform_indices = @transform_6, window_bounds = array<i64: 1, 16, 288>}]} {
    %c0 = arith.constant 0 : index
    %c0_0 = arith.constant 0 : index
    %c0_1 = arith.constant 0 : index
    %0 = vector.load %arg1[%c0, %c0_0, %c0_1] : memref<1x4x342xbf16, #tpu.memory_space<vmem>>, vector<1x4x342xbf16>
    %1 = vector.shape_cast %0 : vector<1x4x342xbf16> to vector<4x342xbf16>
    %2 = vector.extract_strided_slice %1 {offsets = [0, 0], sizes = [4, 288], strides = [1, 1]} : vector<4x342xbf16> to vector<4x288xbf16>
    %c0_2 = arith.constant 0 : index
    %c0_3 = arith.constant 0 : index
    %c0_4 = arith.constant 0 : index
    %3 = vector.load %arg2[%c0_2, %c0_3, %c0_4] : memref<9x16x4xbf16, #tpu.memory_space<vmem>>, vector<1x16x4xbf16>
    %4 = vector.shape_cast %3 : vector<1x16x4xbf16> to vector<16x4xbf16>
    %cst = arith.constant dense<0.000000e+00> : vector<16x288xf32>
    %5 = tpu.matmul %4, %2, %cst {dimension_numbers = #tpu.dot_dimension_numbers<[1], [0], [0], [1], [0, 0, 1, 1], [], []>} : vector<16x4xbf16>, vector<4x288xbf16>, vector<16x288xf32> -> vector<16x288xf32>
    %6 = vector.extract_strided_slice %1 {offsets = [0, 1], sizes = [4, 288], strides = [1, 1]} : vector<4x342xbf16> to vector<4x288xbf16>
    %c1 = arith.constant 1 : index
    %c0_5 = arith.constant 0 : index
    %c0_6 = arith.constant 0 : index
    %7 = vector.load %arg2[%c1, %c0_5, %c0_6] : memref<9x16x4xbf16, #tpu.memory_space<vmem>>, vector<1x16x4xbf16>
    %8 = vector.shape_cast %7 : vector<1x16x4xbf16> to vector<16x4xbf16>
    %cst_7 = arith.constant dense<0.000000e+00> : vector<16x288xf32>
    %9 = tpu.matmul %8, %6, %cst_7 {dimension_numbers = #tpu.dot_dimension_numbers<[1], [0], [0], [1], [0, 0, 1, 1], [], []>} : vector<16x4xbf16>, vector<4x288xbf16>, vector<16x288xf32> -> vector<16x288xf32>
    %10 = arith.addf %5, %9 : vector<16x288xf32>
    %11 = vector.extract_strided_slice %1 {offsets = [0, 2], sizes = [4, 288], strides = [1, 1]} : vector<4x342xbf16> to vector<4x288xbf16>
    %c2 = arith.constant 2 : index
    %c0_8 = arith.constant 0 : index
    %c0_9 = arith.constant 0 : index
    %12 = vector.load %arg2[%c2, %c0_8, %c0_9] : memref<9x16x4xbf16, #tpu.memory_space<vmem>>, vector<1x16x4xbf16>
    %13 = vector.shape_cast %12 : vector<1x16x4xbf16> to vector<16x4xbf16>
    %cst_10 = arith.constant dense<0.000000e+00> : vector<16x288xf32>
    %14 = tpu.matmul %13, %11, %cst_10 {dimension_numbers = #tpu.dot_dimension_numbers<[1], [0], [0], [1], [0, 0, 1, 1], [], []>} : vector<16x4xbf16>, vector<4x288xbf16>, vector<16x288xf32> -> vector<16x288xf32>
    %15 = arith.addf %10, %14 : vector<16x288xf32>
    %16 = vector.extract_strided_slice %1 {offsets = [0, 18], sizes = [4, 288], strides = [1, 1]} : vector<4x342xbf16> to vector<4x288xbf16>
    %c3 = arith.constant 3 : index
    %c0_11 = arith.constant 0 : index
    %c0_12 = arith.constant 0 : index
    %17 = vector.load %arg2[%c3, %c0_11, %c0_12] : memref<9x16x4xbf16, #tpu.memory_space<vmem>>, vector<1x16x4xbf16>
    %18 = vector.shape_cast %17 : vector<1x16x4xbf16> to vector<16x4xbf16>
    %cst_13 = arith.constant dense<0.000000e+00> : vector<16x288xf32>
    %19 = tpu.matmul %18, %16, %cst_13 {dimension_numbers = #tpu.dot_dimension_numbers<[1], [0], [0], [1], [0, 0, 1, 1], [], []>} : vector<16x4xbf16>, vector<4x288xbf16>, vector<16x288xf32> -> vector<16x288xf32>
    %20 = arith.addf %15, %19 : vector<16x288xf32>
    %21 = vector.extract_strided_slice %1 {offsets = [0, 19], sizes = [4, 288], strides = [1, 1]} : vector<4x342xbf16> to vector<4x288xbf16>
    %c4 = arith.constant 4 : index
    %c0_14 = arith.constant 0 : index
    %c0_15 = arith.constant 0 : index
    %22 = vector.load %arg2[%c4, %c0_14, %c0_15] : memref<9x16x4xbf16, #tpu.memory_space<vmem>>, vector<1x16x4xbf16>
    %23 = vector.shape_cast %22 : vector<1x16x4xbf16> to vector<16x4xbf16>
    %cst_16 = arith.constant dense<0.000000e+00> : vector<16x288xf32>
    %24 = tpu.matmul %23, %21, %cst_16 {dimension_numbers = #tpu.dot_dimension_numbers<[1], [0], [0], [1], [0, 0, 1, 1], [], []>} : vector<16x4xbf16>, vector<4x288xbf16>, vector<16x288xf32> -> vector<16x288xf32>
    %25 = arith.addf %20, %24 : vector<16x288xf32>
    %26 = vector.extract_strided_slice %1 {offsets = [0, 20], sizes = [4, 288], strides = [1, 1]} : vector<4x342xbf16> to vector<4x288xbf16>
    %c5 = arith.constant 5 : index
    %c0_17 = arith.constant 0 : index
    %c0_18 = arith.constant 0 : index
    %27 = vector.load %arg2[%c5, %c0_17, %c0_18] : memref<9x16x4xbf16, #tpu.memory_space<vmem>>, vector<1x16x4xbf16>
    %28 = vector.shape_cast %27 : vector<1x16x4xbf16> to vector<16x4xbf16>
    %cst_19 = arith.constant dense<0.000000e+00> : vector<16x288xf32>
    %29 = tpu.matmul %28, %26, %cst_19 {dimension_numbers = #tpu.dot_dimension_numbers<[1], [0], [0], [1], [0, 0, 1, 1], [], []>} : vector<16x4xbf16>, vector<4x288xbf16>, vector<16x288xf32> -> vector<16x288xf32>
    %30 = arith.addf %25, %29 : vector<16x288xf32>
    %31 = vector.extract_strided_slice %1 {offsets = [0, 36], sizes = [4, 288], strides = [1, 1]} : vector<4x342xbf16> to vector<4x288xbf16>
    %c6 = arith.constant 6 : index
    %c0_20 = arith.constant 0 : index
    %c0_21 = arith.constant 0 : index
    %32 = vector.load %arg2[%c6, %c0_20, %c0_21] : memref<9x16x4xbf16, #tpu.memory_space<vmem>>, vector<1x16x4xbf16>
    %33 = vector.shape_cast %32 : vector<1x16x4xbf16> to vector<16x4xbf16>
    %cst_22 = arith.constant dense<0.000000e+00> : vector<16x288xf32>
    %34 = tpu.matmul %33, %31, %cst_22 {dimension_numbers = #tpu.dot_dimension_numbers<[1], [0], [0], [1], [0, 0, 1, 1], [], []>} : vector<16x4xbf16>, vector<4x288xbf16>, vector<16x288xf32> -> vector<16x288xf32>
    %35 = arith.addf %30, %34 : vector<16x288xf32>
    %36 = vector.extract_strided_slice %1 {offsets = [0, 37], sizes = [4, 288], strides = [1, 1]} : vector<4x342xbf16> to vector<4x288xbf16>
    %c7 = arith.constant 7 : index
    %c0_23 = arith.constant 0 : index
    %c0_24 = arith.constant 0 : index
    %37 = vector.load %arg2[%c7, %c0_23, %c0_24] : memref<9x16x4xbf16, #tpu.memory_space<vmem>>, vector<1x16x4xbf16>
    %38 = vector.shape_cast %37 : vector<1x16x4xbf16> to vector<16x4xbf16>
    %cst_25 = arith.constant dense<0.000000e+00> : vector<16x288xf32>
    %39 = tpu.matmul %38, %36, %cst_25 {dimension_numbers = #tpu.dot_dimension_numbers<[1], [0], [0], [1], [0, 0, 1, 1], [], []>} : vector<16x4xbf16>, vector<4x288xbf16>, vector<16x288xf32> -> vector<16x288xf32>
    %40 = arith.addf %35, %39 : vector<16x288xf32>
    %41 = vector.extract_strided_slice %1 {offsets = [0, 38], sizes = [4, 288], strides = [1, 1]} : vector<4x342xbf16> to vector<4x288xbf16>
    %c8 = arith.constant 8 : index
    %c0_26 = arith.constant 0 : index
    %c0_27 = arith.constant 0 : index
    %42 = vector.load %arg2[%c8, %c0_26, %c0_27] : memref<9x16x4xbf16, #tpu.memory_space<vmem>>, vector<1x16x4xbf16>
    %43 = vector.shape_cast %42 : vector<1x16x4xbf16> to vector<16x4xbf16>
    %cst_28 = arith.constant dense<0.000000e+00> : vector<16x288xf32>
    %44 = tpu.matmul %43, %41, %cst_28 {dimension_numbers = #tpu.dot_dimension_numbers<[1], [0], [0], [1], [0, 0, 1, 1], [], []>} : vector<16x4xbf16>, vector<4x288xbf16>, vector<16x288xf32> -> vector<16x288xf32>
    %45 = arith.addf %40, %44 : vector<16x288xf32>
    %c0_29 = arith.constant 0 : index
    %c0_30 = arith.constant 0 : index
    %46 = vector.load %arg3[%c0_29, %c0_30] : memref<16x1xf32, #tpu.memory_space<vmem>>, vector<16x1xf32>
    %47 = vector.broadcast %46 : vector<16x1xf32> to vector<16x288xf32>
    %48 = arith.addf %45, %47 : vector<16x288xf32>
    %49 = arith.mulf %48, %48 : vector<16x288xf32>
    %c0_31 = arith.constant 0 : index
    %c0_32 = arith.constant 0 : index
    %50 = vector.load %arg5[%c0_31, %c0_32] : memref<288x16xf32, #tpu.memory_space<vmem>>, vector<288x16xf32>
    %cst_33 = arith.constant dense<0.000000e+00> : vector<16x16xf32>
    %51 = tpu.matmul %49, %50, %cst_33 {dimension_numbers = #tpu.dot_dimension_numbers<[1], [0], [0], [1], [0, 0, 1, 1], [], []>} : vector<16x288xf32>, vector<288x16xf32>, vector<16x16xf32> -> vector<16x16xf32>
    %cst_34 = arith.constant 1.1920929E-7 : f32
    %52 = vector.broadcast %cst_34 : f32 to vector<16x16xf32>
    %53 = arith.addf %51, %52 : vector<16x16xf32>
    %54 = math.rsqrt %53 : vector<16x16xf32>
    %c0_35 = arith.constant 0 : index
    %c0_36 = arith.constant 0 : index
    %55 = vector.load %arg6[%c0_35, %c0_36] : memref<16x288xf32, #tpu.memory_space<vmem>>, vector<16x288xf32>
    %cst_37 = arith.constant dense<0.000000e+00> : vector<16x288xf32>
    %56 = tpu.matmul %54, %55, %cst_37 {dimension_numbers = #tpu.dot_dimension_numbers<[1], [0], [0], [1], [0, 0, 1, 1], [], []>} : vector<16x16xf32>, vector<16x288xf32>, vector<16x288xf32> -> vector<16x288xf32>
    %57 = arith.mulf %48, %56 : vector<16x288xf32>
    %c0_38 = arith.constant 0 : index
    %c0_39 = arith.constant 0 : index
    %58 = vector.load %arg4[%c0_38, %c0_39] : memref<1x288xf32, #tpu.memory_space<vmem>>, vector<1x288xf32>
    %59 = vector.broadcast %58 : vector<1x288xf32> to vector<16x288xf32>
    %60 = arith.mulf %57, %59 : vector<16x288xf32>
    %cst_40 = arith.constant 0.000000e+00 : f32
    %61 = vector.broadcast %cst_40 : f32 to vector<16x288xf32>
    %62 = arith.maximumf %60, %61 : vector<16x288xf32>
    %c0_41 = arith.constant 0 : index
    %c0_42 = arith.constant 0 : index
    %c0_43 = arith.constant 0 : index
    %63 = vector.load %arg7[%c0_41, %c0_42, %c0_43] : memref<1x16x288xf32, #tpu.memory_space<vmem>>, vector<1x16x288xf32>
    %64 = vector.shape_cast %63 : vector<1x16x288xf32> to vector<16x288xf32>
    %65 = vector.shape_cast %62 : vector<16x288xf32> to vector<1x16x288xf32>
    tpu.vector_store %arg7[%c0_41, %c0_42, %c0_43], %65 {strides = array<i32>} : memref<1x16x288xf32, #tpu.memory_space<vmem>>, vector<1x16x288xf32>,
    return
  }
  func.func @transform_0(%arg0: i32) -> (i32, i32, i32) {
    %c0_i32 = arith.constant 0 : i32
    %c0_i32_0 = arith.constant 0 : i32
    %c0_i32_1 = arith.constant 0 : i32
    return %arg0, %c0_i32, %c0_i32_0 : i32, i32, i32
  }
  func.func @transform_1(%arg0: i32) -> (i32, i32, i32) {
    %c0_i32 = arith.constant 0 : i32
    %c0_i32_0 = arith.constant 0 : i32
    %c0_i32_1 = arith.constant 0 : i32
    %c0_i32_2 = arith.constant 0 : i32
    return %c0_i32, %c0_i32_0, %c0_i32_1 : i32, i32, i32
  }
  func.func @transform_2(%arg0: i32) -> (i32, i32) {
    %c0_i32 = arith.constant 0 : i32
    %c0_i32_0 = arith.constant 0 : i32
    %c0_i32_1 = arith.constant 0 : i32
    return %c0_i32, %c0_i32_0 : i32, i32
  }
  func.func @transform_3(%arg0: i32) -> (i32, i32) {
    %c0_i32 = arith.constant 0 : i32
    %c0_i32_0 = arith.constant 0 : i32
    %c0_i32_1 = arith.constant 0 : i32
    return %c0_i32, %c0_i32_0 : i32, i32
  }
  func.func @transform_4(%arg0: i32) -> (i32, i32) {
    %c0_i32 = arith.constant 0 : i32
    %c0_i32_0 = arith.constant 0 : i32
    %c0_i32_1 = arith.constant 0 : i32
    return %c0_i32, %c0_i32_0 : i32, i32
  }
  func.func @transform_5(%arg0: i32) -> (i32, i32) {
    %c0_i32 = arith.constant 0 : i32
    %c0_i32_0 = arith.constant 0 : i32
    %c0_i32_1 = arith.constant 0 : i32
    return %c0_i32, %c0_i32_0 : i32, i32
  }
  func.func @transform_6(%arg0: i32) -> (i32, i32, i32) {
    %c0_i32 = arith.constant 0 : i32
    %c0_i32_0 = arith.constant 0 : i32
    %c0_i32_1 = arith.constant 0 : i32
    return %arg0, %c0_i32, %c0_i32_0 : i32, i32, i32
  }
}

</mosaic_0001>

<bundles_post_ra>
// kernel: tpu_custom_call.1
= control target key start
LH: loop header
LB: loop body
LE: loop exit
PB: predicated region body
PF: predicated region fallthrough
CT: control target
= control target key end

     0   :  { %11 = vsyncpa [#allocation3], 0  ;;  %s2708_s0 = inlined_call_operand.vmem [shape: bf16[2,4,342], index: 0, kind: input, shape index: {}]   ;;  %s2709_s1 = inlined_call_operand.vmem [shape: bf16[9,16,4], index: 1, kind: input, shape index: {}]   ;;  %s2710_s2 = inlined_call_operand.vmem [shape: f32[16,1], index: 2, kind: input, shape index: {}]   ;;  %s2711_s3 = inlined_call_operand.vmem [shape: f32[1,288], index: 3, kind: input, shape index: {}]   ;;  %s2712_s4 = inlined_call_operand.vmem [shape: f32[288,16], index: 4, kind: input, shape index: {}]   ;;  %s2713_s5 = inlined_call_operand.vmem [shape: f32[16,288], index: 5, kind: input, shape index: {}]   ;;  %s2714_s6 = inlined_call_operand.hbm [shape: f32[2,16,288], index: 6, kind: output, shape index: {}]  }
   0x1   :  { %13 = vsyncpa [#allocation3 + $0x1], 0  ;;  %s2291_s21 = smov 0   ;;  %s2293_s22 = smov 0  }
   0x2   :  { %s2295_s23 = smov 0   ;;  %s2297_s24 = smov 0  }
   0x3 LB: > { %s2312_s25 = sadd.s32 4294967295, %s2239_s24   ;;  %s1821_s26 = sadd.s32 4294967294, %s2239_s24   ;;  %s2239_s24 = sphi %s2297_s24, %s2720_s24   ;;  %s2235_s23 = sphi %s2295_s23, %s2719_s23   ;;  %s2231_s22 = sphi %s2293_s22, %s2718_s22   ;;  %s2227_s21 = sphi %s2291_s21, %s2717_s21  }
   0x4   : > { %s2316_s27 = sadd.s32 1, %s2239_s24   ;;  %s157_s28 = sadd.s32 1, %s2235_s23 }
   0x5   : > { %s154_s29 = ssub.s32 %s2239_s24, %s2316_s27  ;;  %p167_p0 = scmp.ne.s32.totalorder %s2235_s23, %s2231_s22 }
   0x6   : > { %p155_p1 = scmp.eq.s32.totalorder %s154_s29, 0  ;;  %p168_p2 = scmp.eq.s32.totalorder %s2312_s25, 1 }
   0x7   : > { %p173_p3 = scmp.ne.s32.totalorder %s2231_s22, %s2227_s21  ;;  %p174_p4 = scmp.eq.s32.totalorder %s1821_s26, 1 }
   0x8   : > { %s2327_s30 = scalar_select %p155_p1, %s2235_s23, %s157_s28  }
   0x9   : > { %p2329_p5 = por %p168_p2, %p167_p0  ;;  %p2333_p6 = por %p174_p4, %p173_p3 }
   0xa   : > { %p1824_p7 = scmp.ge.s32.totalorder %s2239_s24, 1  ;;  %p215_p8 = scmp.lt.s32.totalorder %s2239_s24, 3 }
   0xc   : > { %p216_p9 = pnand %p1824_p7, %p215_p8 }
   0xd   : > { %p245_p10 = scmp.lt.s32.totalorder (!%p216_p9), %s2312_s25, 1  ;;  %v267_v0 = vlaneseq (!%p216_p9)  ;;  %v2241_v1 = vmov (!%p216_p9), 1983009808   ;;  %v2242_v3 = vmov (!%p216_p9), 0   ;;  %vm292_vm0 = vcmask (!%p216_p9), 1041408   ;;  %s2243_s14 = smov (!%p216_p9), 127  }
   0xe   : > { %219 = sbr.rel (%p216_p9) target bundleno = 917 (0x395), region = 44  ;;  %v265_v2 = vunpack.c.l.s4 (!%p216_p9), %v2241_v1  ;;  %435 = vmatprep.mubr.bf16.mxu0 (!%p216_p9), %v2242_v3  ;;  %334 = vmatprep.mubr.bf16.mxu1 (!%p216_p9), %v2242_v3  ;;  %s2244_s15 = smov (!%p216_p9), 126   ;;  %v2358_v13 = vld [vmem:[%s2709_s1] sm:$0xff] (!%p216_p9)   ;;  %vm288_vm1 = vcmask (!%p216_p9), 31744   ;;  %v1321_v15 = vld [vmem:[%s2710_s2 + $0x8] sm:$0xff] (!%p216_p9)  ;;  %vm501_vm2 = vcmask (!%p216_p9), 1031168  }
   0xf   : > { %v2343_v4 = vshrl.u32 (!%p216_p9), %v267_v0, 7  ;;  %2161 = vset.pattern.permute.xlu0 (!%p216_p9), %v2242_v3  ;;  %2162 = vset.pattern.permute.xlu1 (!%p216_p9), %v2242_v3  ;;  %s2245_s18 = smov (!%p216_p9), 110   ;;  %s2246_s19 = smov (!%p216_p9), 109   ;;  %v1320_v14 = vld [vmem:[%s2710_s2] sm:$0xff] (!%p216_p9)  ;;  %vm285_vm3 = vcmask (!%p216_p9), 1039360   ;;  %v2382_v23 = vld [vmem:[%s2709_s1 + $0x10] sm:$0xff] (!%p216_p9)  }
  0x10   : > { %v266_v5 = vunpack.c.0.s8 (!%p216_p9), %v265_v2  ;;  %s2247_s20 = smov (!%p216_p9), 108   ;;  %s2248_s26 = smov (!%p216_p9), 92   ;;  %v2166_v29 = vld [vmem:[%s2709_s1 + $0x8] sm:$0xff] (!%p216_p9)   ;;  %vm620_vm4 = vcmask (!%p216_p9), 900096   ;;  %v2251_v32 = vmov (!%p216_p9), 0.0   ;;  %vm2252_vm5 = vmmov (!%p216_p9), 0  }
  0x11   : > { %s2249_s28 = smov (!%p216_p9), 91   ;;  %s2250_s29 = smov (!%p216_p9), 90   ;;  %v2167_v39 = vld [vmem:[%s2709_s1 + $0x18] sm:$0xff] (!%p216_p9)   ;;  %vm739_vm6 = vcmask (!%p216_p9), 891904   ;;  %vm858_vm7 = vcmask (!%p216_p9), 883712   ;;  %v2168_v53 = vld [vmem:[%s2709_s1 + $0x20] sm:$0xff] (!%p216_p9)  }
  0x12   : > { %v269_v6 = vsub.s32 (!%p216_p9), %v266_v5, %v2343_v4  ;;  %vm977_vm8 = vcmask (!%p216_p9), 752640   ;;  %v2169_v61 = vld [vmem:[%s2709_s1 + $0x28] sm:$0xff] (!%p216_p9)   ;;  %vm1096_vm9 = vcmask (!%p216_p9), 744448   ;;  %vm1215_vm10 = vcmask (!%p216_p9), 736256  }
  0x13   : > { %vm1380_vm11 = vcmask (!%p216_p9), 261120   ;;  %vm1545_vm12 = vcmask (!%p216_p9), 130048  }
  0x15   : > { %s246_s9 = scalar_select %p245_p10, %s2312_s25, 1 }
  0x17   : > { %s2106_s10 = smul.u32 6, %s246_s9 }
  0x19   : > { %s249_s13 = scalar_lea.vmem %s2708_s0, %s2106_s10  ;;  %s242_s10 = sand.u32 1, %s2231_s22  }
  0x1a   : > { %v251_v7 = vld [vmem:[%s249_s13] sm:$0x3f]  ;;  %s2105_s11 = smul.u32 48, %s242_s10 }
  0x1b   : > { %v270_v8 = vrot.slane %v251_v7, %v269_v6  ;;  %v263_v9 = vcombine.high %v251_v7, %v251_v7 }
  0x1c   : > { %s244_s12 = scalar_lea.vmem [#allocation2], %s2105_s11 }
  0x1d   : > { %279 = vrot.lane.b32.xlu1 %v270_v8, %s2243_s14  ;;  %495 = vrot.lane.b32.xlu0 %v270_v8, %s2244_s15  ;;  %v278_v10 = vcombine.high %v270_v8, %v270_v8  ;;  %v2351_v11 = vrot.slane %v263_v9, %v269_v6  ;;  %v395_v12 = vsel %vm292_vm0, %v270_v8, 0  ;;  %s1759_s13 = sshll.u32 %s244_s12, 4  ;;  %s2656_s13 = int_to_ptr.vmem [resolvable:$true] %s1759_s13 }
  0x1f   : > { %1833 = vmatprep.subr.msk.bf16.mxu0 %vm292_vm0, %v278_v10  ;;  %v401_v42 = vsel %vm292_vm0, %v2351_v11, 0 }
  0x20   : > { %404 = vmatpush1.bf16.msra.mxu0 %v395_v12 }
  0x21   : > { %497 = vrot.lane.b32.xlu0 %v278_v10, %s2244_s15  ;;  %499 = vrot.lane.b32.xlu1 %v2351_v11, %s2244_s15 }
  0x23   : > { %1834 = vmatmul.mubr.msk.bf16.vlgmr.msra.gmra.mrb[0].mxu0 %vm288_vm1, %v2358_v13 }
  0x24   : > { %548 = vmatprep.mubr.bf16.mxu0 %v2242_v3 }
  0x25   : > { %281 = vrot.lane.b32.xlu0 %v278_v10, %s2243_s14  ;;  %283 = vrot.lane.b32.xlu1 %v2351_v11, %s2243_s14  ;;  %s2107_s14 = smul.u32 768, %s2312_s25  ;;  %s2667_s25 = scalar_lea.sflag [#allocation3], %s242_s10 }
  0x27   : > { %s2661_s17 = scalar_lea.hbm %s2714_s6, %s2107_s14 }
  0x29   : > { %614 = vrot.lane.b32.xlu0 %v270_v8, %s2245_s18  ;;  %616 = vrot.lane.b32.xlu1 %v278_v10, %s2245_s18 }
  0x2d   : > { %618 = vrot.lane.b32.xlu0 %v2351_v11, %s2245_s18  ;;  %733 = vrot.lane.b32.xlu1 %v270_v8, %s2246_s19  ;;  %s2177_s18 = scalar_lea.vmem %s2656_s13, 768 }
  0x2e   : > { %p2178_p11 = scmp.ne.s32.totalorder %s2656_s13, %s2177_s18 }
  0x30   : > { %p2179_p12 = pnand %p2178_p11, %p2329_p5 }
  0x31   : > { %735 = vrot.lane.b32.xlu0 %v278_v10, %s2246_s19  ;;  %737 = vrot.lane.b32.xlu1 %v2351_v11, %s2246_s19  ;;  %s2253_s19 = smov [#allocation2]  }
  0x32   : > { %p2180_p13 = pneg %p2179_p12 }
  0x35   : > { %852 = vrot.lane.b32.xlu0 %v270_v8, %s2247_s20  ;;  %854 = vrot.lane.b32.xlu1 %v278_v10, %s2247_s20 }
  0x39   : > { %856 = vrot.lane.b32.xlu0 %v2351_v11, %s2247_s20  ;;  %971 = vrot.lane.b32.xlu1 %v270_v8, %s2248_s26  ;;  %s2181_s20 = sshll.u32 %s2253_s19, 4  ;;  %s2182_s20 = int_to_ptr.vmem [resolvable:$false] %s2181_s20 }
  0x3a   : > { %p2184_p0 = scmp.lt.s32.totalorder %s2656_s13, %s2182_s20 }
  0x3d   : > { %973 = vrot.lane.b32.xlu0 %v278_v10, %s2248_s26  ;;  %975 = vrot.lane.b32.xlu1 %v2351_v11, %s2248_s26  ;;  %s2183_s26 = scalar_lea.vmem %s2182_s20, 1536 }
  0x3e   : > { %p2185_p1 = scmp.lt.s32.totalorder %s2183_s26, %s2177_s18 }
  0x40   : > { %p2186_p2 = por %p2185_p1, %p2184_p0 }
  0x41   : > { %1090 = vrot.lane.b32.xlu0 %v270_v8, %s2249_s28  ;;  %1092 = vrot.lane.b32.xlu1 %v278_v10, %s2249_s28 }
  0x42   : > { %p2187_p3 = pnand %p2186_p2, %p2180_p13 }
  0x45   : > { %1094 = vrot.lane.b32.xlu0 %v2351_v11, %s2249_s28  ;;  %1209 = vrot.lane.b32.xlu1 %v270_v8, %s2250_s29  ;;  %v2170_v8 = vld [vmem:[%s2709_s1 + $0x30] sm:$0xff]  }
  0x49   : > { %1211 = vrot.lane.b32.xlu0 %v278_v10, %s2250_s29  ;;  %1213 = vrot.lane.b32.xlu1 %v2351_v11, %s2250_s29 }
  0x4d   : > { %1324 = vperm.xlu0 %2161, %v1320_v14   ;;  %1329 = vperm.xlu1 %2162, %v1321_v15   ;;  %v2171_v15 = vld [vmem:[%s2709_s1 + $0x38] sm:$0xff]  }
  0x8f   : > { %v280_v16 = vpop.permute.xlu1 %279  ;;  %v496_v17 = vpop.permute.xlu0 %495 }
  0x93   : > { %v498_v18 = vpop.permute.xlu0 %497  ;;  %v500_v19 = vpop.permute.xlu1 %499 }
  0x94   : > { %v502_v20 = vsel %vm501_vm2, %v496_v17, %v498_v18  ;;  %v503_v21 = vsel %vm501_vm2, %v498_v18, %v500_v19  ;;  %v514_v52 = vsel %vm292_vm0, %v500_v19, 0  ;;  %v2172_v19 = vld [vmem:[%s2709_s1 + $0x40] sm:$0xff]  }
  0x95   : > { %v508_v22 = vsel %vm292_vm0, %v502_v20, 0  ;;  %1839 = vmatprep.subr.msk.bf16.mxu0 %vm292_vm0, %v503_v21  ;;  %v1361_v20 = vld [vmem:[%s2712_s4 + $0x88] sm:$0xff]  ;;  %v1344_v21 = vld [vmem:[%s2712_s4] sm:$0xff] }
  0x96   : > { %517 = vmatpush1.bf16.msra.mxu0 %v508_v22 }
  0x97   : > { %v282_v24 = vpop.permute.xlu0 %281  ;;  %v284_v25 = vpop.permute.xlu1 %283 }
  0x98   : > { %v287_v26 = vsel %vm285_vm3, %v282_v24, %v284_v25  ;;  %v286_v27 = vsel %vm285_vm3, %v280_v16, %v282_v24  ;;  %v300_v33 = vsel %vm292_vm0, %v284_v25, 0  ;;  %v1362_v25 = vld [vmem:[%s2712_s4 + $0x90] sm:$0xff] }
  0x99   : > { %1829 = vmatprep.subr.msk.bf16.mxu1 %vm292_vm0, %v287_v26  ;;  %1840 = vmatmul.mubr.msk.bf16.vlgmr.msra.gmra.mrb[0].mxu0 %vm288_vm1, %v2382_v23  ;;  %v294_v28 = vsel %vm292_vm0, %v286_v27, 0  ;;  %v1363_v26 = vld [vmem:[%s2712_s4 + $0x98] sm:$0xff] }
  0x9a   : > { %303 = vmatpush1.bf16.msra.mxu1 %v294_v28  ;;  %667 = vmatprep.mubr.bf16.mxu0 %v2242_v3  ;;  %v2029_v27 = vpack.c.bf16 %v1363_v26, %v1362_v25  ;;  %v1346_v28 = vld [vmem:[%s2712_s4 + $0x10] sm:$0xff] }
  0x9b   : > { %v615_v30 = vpop.permute.xlu0 %614  ;;  %v617_v31 = vpop.permute.xlu1 %616  ;;  %1953 = vmatprep.subr.bf16.mxu1 %v2251_v32 }
  0x9c   : > { %v621_v34 = vsel %vm620_vm4, %v615_v30, %v617_v31 }
  0x9d   : > { %1830 = vmatmul.mubr.msk.bf16.vlgmr.msra.gmra.mrb[0].mxu1 %vm288_vm1, %v2166_v29  ;;  %v627_v38 = vsel %vm292_vm0, %v621_v34, 0  ;;  %v1348_v34 = vld [vmem:[%s2712_s4 + $0x20] sm:$0xff] }
  0x9e   : > { %1954 = vmatpush3.bf16.msra.mxu1 %v300_v33  ;;  %1955 = vmatprep.mubr.msk.bf16.mxu1 %vm2252_vm5, %v2251_v32  ;;  %v1365_v33 = vld [vmem:[%s2712_s4 + $0xa8] sm:$0xff] }
  0x9f   : > { %v619_v35 = vpop.permute.xlu0 %618  ;;  %v734_v36 = vpop.permute.xlu1 %733  ;;  %1959 = vmatprep.subr.bf16.mxu1 %v2251_v32 }
  0xa0   : > { %v622_v37 = vsel %vm620_vm4, %v617_v31, %v619_v35  ;;  %v633_v59 = vsel %vm292_vm0, %v619_v35, 0  ;;  %v1364_v31 = vld [vmem:[%s2712_s4 + $0xa0] sm:$0xff] }
  0xa1   : > { %1845 = vmatprep.subr.msk.bf16.mxu0 %vm292_vm0, %v622_v37  ;;  %v2033_v35 = vpack.c.bf16 %v1365_v33, %v1364_v31 }
  0xa2   : > { %636 = vmatpush1.bf16.msra.mxu0 %v627_v38  ;;  %v1366_v38 = vld [vmem:[%s2712_s4 + $0xb0] sm:$0xff] }
  0xa3   : > { %v736_v40 = vpop.permute.xlu0 %735  ;;  %v738_v41 = vpop.permute.xlu1 %737 }
  0xa4   : > { %v740_v43 = vsel %vm739_vm6, %v734_v36, %v736_v40  ;;  %v741_v44 = vsel %vm739_vm6, %v736_v40, %v738_v41  ;;  %v752_v1 = vsel %vm292_vm0, %v738_v41, 0  ;;  %v1349_v36 = vld [vmem:[%s2712_s4 + $0x28] sm:$0xff]  ;;  %v1350_v41 = vld [vmem:[%s2712_s4 + $0x30] sm:$0xff] }
  0xa5   : > { %1956 = vmatmul.mubr.msk.bf16.vlgmr.msra.gmra.mrb[4].mxu1 %vm288_vm1, %v2166_v29  ;;  %1846 = vmatmul.mubr.msk.bf16.vlgmr.msra.gmra.mrb[0].mxu0 %vm288_vm1, %v2167_v39  ;;  %v746_v45 = vsel %vm292_vm0, %v740_v43, 0  ;;  %v1347_v29 = vld [vmem:[%s2712_s4 + $0x18] sm:$0xff]  ;;  %v2035_v37 = vpack.c.bf16 %v1349_v36, %v1348_v34 }
  0xa6   : > { %1960 = vmatpush3.bf16.msra.mxu1 %v401_v42  ;;  %1851 = vmatprep.subr.msk.bf16.mxu0 %vm292_vm0, %v741_v44  ;;  %v2031_v30 = vpack.c.bf16 %v1347_v29, %v1346_v28  ;;  %v1351_v42 = vld [vmem:[%s2712_s4 + $0x38] sm:$0xff]  ;;  %v1368_v44 = vld [vmem:[%s2712_s4 + $0xc0] sm:$0xff] }
  0xa7   : > { %755 = vmatpush1.bf16.msra.mxu0 %v746_v45  ;;  %1961 = vmatprep.mubr.msk.bf16.mxu1 %vm2252_vm5, %v2251_v32  ;;  %v853_v46 = vpop.permute.xlu0 %852  ;;  %v855_v47 = vpop.permute.xlu1 %854  ;;  %v2039_v43 = vpack.c.bf16 %v1351_v42, %v1350_v41  ;;  %v1369_v45 = vld [vmem:[%s2712_s4 + $0xc8] sm:$0xff] }
  0xa8   : > { %1965 = vmatprep.subr.bf16.mxu1 %v2251_v32  ;;  %786 = vmatprep.mubr.bf16.mxu0 %v2242_v3  ;;  %v859_v50 = vsel %vm858_vm7, %v853_v46, %v855_v47  ;;  %v1352_v46 = vld [vmem:[%s2712_s4 + $0x40] sm:$0xff] }
  0xa9   : > { %v865_v54 = vsel %vm292_vm0, %v859_v50, 0  ;;  %v1370_v50 = vld [vmem:[%s2712_s4 + $0xd0] sm:$0xff] }
  0xab   : > { %v857_v48 = vpop.permute.xlu0 %856  ;;  %v972_v49 = vpop.permute.xlu1 %971 }
  0xac   : > { %v860_v51 = vsel %vm858_vm7, %v855_v47, %v857_v48  ;;  %v871_v7 = vsel %vm292_vm0, %v857_v48, 0  ;;  %v2041_v47 = vpack.c.bf16 %v1369_v45, %v1368_v44  ;;  %v1353_v48 = vld [vmem:[%s2712_s4 + $0x48] sm:$0xff] }
  0xad   : > { %1962 = vmatmul.mubr.msk.bf16.vlgmr.msra.gmra.mrb[8].mxu1 %vm288_vm1, %v2358_v13  ;;  %1857 = vmatprep.subr.msk.bf16.mxu0 %vm292_vm0, %v860_v51  ;;  %v1371_v51 = vld [vmem:[%s2712_s4 + $0xd8] sm:$0xff] }
  0xae   : > { %1966 = vmatpush3.bf16.msra.mxu1 %v514_v52  ;;  %1967 = vmatprep.mubr.msk.bf16.mxu1 %vm2252_vm5, %v2251_v32  ;;  %v2045_v52 = vpack.c.bf16 %v1371_v51, %v1370_v50 }
  0xaf   : > { %1971 = vmatprep.subr.bf16.mxu1 %v2251_v32  ;;  %v974_v55 = vpop.permute.xlu0 %973  ;;  %v976_v56 = vpop.permute.xlu1 %975 }
  0xb0   : > { %v979_v57 = vsel %vm977_vm8, %v974_v55, %v976_v56  ;;  %v978_v60 = vsel %vm977_vm8, %v972_v49, %v974_v55  ;;  %v990_v13 = vsel %vm292_vm0, %v976_v56, 0  ;;  %v2043_v49 = vpack.c.bf16 %v1353_v48, %v1352_v46  ;;  %v1372_v56 = vld [vmem:[%s2712_s4 + $0xe0] sm:$0xff] }
  0xb1   : > { %1852 = vmatmul.mubr.msk.bf16.vlgmr.msra.gmra.mrb[0].mxu0 %vm288_vm1, %v2168_v53  ;;  %v984_v0 = vsel %vm292_vm0, %v978_v60, 0  ;;  %v1357_v60 = vld [vmem:[%s2712_s4 + $0x68] sm:$0xff] }
  0xb2   : > { %874 = vmatpush1.bf16.msra.mxu0 %v865_v54  ;;  %905 = vmatprep.mubr.bf16.mxu0 %v2242_v3  ;;  %v1355_v54 = vld [vmem:[%s2712_s4 + $0x58] sm:$0xff] }
  0xb3   : > { %1863 = vmatprep.subr.msk.bf16.mxu0 %vm292_vm0, %v979_v57  ;;  %v1091_v58 = vpop.permute.xlu0 %1090  ;;  %v1093_v63 = vpop.permute.xlu1 %1092  ;;  %v1373_v57 = vld [vmem:[%s2712_s4 + $0xe8] sm:$0xff] }
  0xb4   : > { %v1097_v6 = vsel %vm1096_vm9, %v1091_v58, %v1093_v63  ;;  %v2049_v58 = vpack.c.bf16 %v1373_v57, %v1372_v56 }
  0xb5   : > { %1968 = vmatmul.mubr.msk.bf16.vlgmr.msra.gmra.mrb[12].mxu1 %vm288_vm1, %v2382_v23  ;;  %v1103_v11 = vsel %vm292_vm0, %v1097_v6, 0  ;;  %v1345_v23 = vld [vmem:[%s2712_s4 + $0x8] sm:$0xff]  ;;  %v1359_v6 = vld [vmem:[%s2712_s4 + $0x78] sm:$0xff] }
  0xb6   : > { %1972 = vmatpush3.bf16.msra.mxu1 %v633_v59  ;;  %1973 = vmatprep.mubr.msk.bf16.mxu1 %vm2252_vm5, %v2251_v32  ;;  %v2027_v24 = vpack.c.bf16 %v1345_v23, %v1344_v21  ;;  %v1356_v59 = vld [vmem:[%s2712_s4 + $0x60] sm:$0xff] }
  0xb7   : > { %1977 = vmatprep.subr.bf16.mxu1 %v2251_v32  ;;  %v1095_v62 = vpop.permute.xlu0 %1094  ;;  %v1210_v5 = vpop.permute.xlu1 %1209 }
  0xb8   : > { %v1098_v2 = vsel %vm1096_vm9, %v1093_v63, %v1095_v62  ;;  %v1109_v17 = vsel %vm292_vm0, %v1095_v62, 0  ;;  %v1374_v62 = vld [vmem:[%s2712_s4 + $0xf0] sm:$0xff]  ;;  %v1375_v63 = vld [vmem:[%s2712_s4 + $0xf8] sm:$0xff] }
  0xbb   : > { %v1212_v9 = vpop.permute.xlu0 %1211  ;;  %v1214_v10 = vpop.permute.xlu1 %1213 }
  0xbc   : > { %v1217_v12 = vsel %vm1215_vm10, %v1212_v9, %v1214_v10  ;;  %v1216_v14 = vsel %vm1215_vm10, %v1210_v5, %v1212_v9  ;;  %v1228_v18 = vsel %vm292_vm0, %v1214_v10, 0  ;;  %v1358_v5 = vld [vmem:[%s2712_s4 + $0x70] sm:$0xff]  ;;  %v1379_v10 = vld [vmem:[%s2712_s4 + $0x118] sm:$0xff] }
  0xbd   : > { %1974 = vmatmul.mubr.msk.bf16.vlgmr.msra.gmra.mrb[16].mxu1 %vm288_vm1, %v2167_v39  ;;  %1858 = vmatmul.mubr.msk.bf16.vlgmr.msra.gmra.mrb[0].mxu0 %vm288_vm1, %v2169_v61  ;;  %v1222_v16 = vsel %vm292_vm0, %v1216_v14, 0  ;;  %v1367_v39 = vld [vmem:[%s2712_s4 + $0xb8] sm:$0xff]  ;;  %v1378_v9 = vld [vmem:[%s2712_s4 + $0x110] sm:$0xff] }
  0xbe   : > { %1978 = vmatpush3.bf16.msra.mxu1 %v752_v1  ;;  %993 = vmatpush1.bf16.msra.mxu0 %v984_v0  ;;  %v2037_v40 = vpack.c.bf16 %v1367_v39, %v1366_v38  ;;  %v1376_v0 = vld [vmem:[%s2712_s4 + $0x100] sm:$0xff]  ;;  %v2053_v1 = vpack.c.bf16 %v1375_v63, %v1374_v62 }
  0xbf   : > { %1979 = vmatprep.mubr.msk.bf16.mxu1 %vm2252_vm5, %v2251_v32  ;;  %1983 = vmatprep.subr.bf16.mxu1 %v2251_v32 }
  0xc0   : > { %1024 = vmatprep.mubr.bf16.mxu0 %v2242_v3  ;;  %1869 = vmatprep.subr.msk.bf16.mxu0 %vm292_vm0, %v1098_v2  ;;  %v1377_v2 = vld [vmem:[%s2712_s4 + $0x108] sm:$0xff] }
  0xc5   : > { %1980 = vmatmul.mubr.msk.bf16.vlgmr.msra.gmra.mrb[20].mxu1 %vm288_vm1, %v2168_v53  ;;  %v1354_v53 = vld [vmem:[%s2712_s4 + $0x50] sm:$0xff] }
  0xc6   : > { %1984 = vmatpush3.bf16.msra.mxu1 %v871_v7  ;;  %1985 = vmatprep.mubr.msk.bf16.mxu1 %vm2252_vm5, %v2251_v32  ;;  %v2047_v55 = vpack.c.bf16 %v1355_v54, %v1354_v53  ;;  %v2057_v7 = vpack.c.bf16 %v1377_v2, %v1376_v0 }
  0xc7   : > { %1989 = vmatprep.subr.bf16.mxu1 %v2251_v32 }
  0xc9   : > { %1864 = vmatmul.mubr.msk.bf16.vlgmr.msra.gmra.mrb[0].mxu0 %vm288_vm1, %v2170_v8 }
  0xca   : > { %1112 = vmatpush1.bf16.msra.mxu0 %v1103_v11  ;;  %1143 = vmatprep.mubr.bf16.mxu0 %v2242_v3  ;;  %v2061_v11 = vpack.c.bf16 %v1379_v10, %v1378_v9 }
  0xcb   : > { %1875 = vmatprep.subr.msk.bf16.mxu0 %vm292_vm0, %v1217_v12 }
  0xcc   : > { %v1325_v63 = vpop.permute.xlu0 %1324  ;;  %v1330_v9 = vpop.permute.xlu1 %1329 }
  0xcd   : > { %1986 = vmatmul.mubr.msk.bf16.vlgmr.msra.gmra.mrb[24].mxu1 %vm288_vm1, %v2169_v61  ;;  %v2051_v61 = vpack.c.bf16 %v1357_v60, %v1356_v59 }
  0xce   : > { %1990 = vmatpush3.bf16.msra.mxu1 %v990_v13  ;;  %1991 = vmatprep.mubr.msk.bf16.mxu1 %vm2252_vm5, %v2251_v32 }
  0xcf   : > { %1995 = vmatprep.subr.bf16.mxu1 %v2251_v32 }
  0xd5   : > { %1992 = vmatmul.mubr.msk.bf16.vlgmr.msra.gmra.mrb[28].mxu1 %vm288_vm1, %v2170_v8  ;;  %1870 = vmatmul.mubr.msk.bf16.vlgmr.msra.gmra.mrb[0].mxu0 %vm288_vm1, %v2171_v15  ;;  %v2055_v8 = vpack.c.bf16 %v1359_v6, %v1358_v5 }
  0xd6   : > { %1996 = vmatpush3.bf16.msra.mxu1 %v1109_v17  ;;  %1231 = vmatpush1.bf16.msra.mxu0 %v1222_v16 }
  0xd7   : > { %1997 = vmatprep.mubr.msk.bf16.mxu1 %vm2252_vm5, %v2251_v32  ;;  %2001 = vmatprep.subr.bf16.mxu1 %v2251_v32 }
  0xd8   : > { %1262 = vmatprep.mubr.bf16.mxu0 %v2242_v3  ;;  %v1360_v3 = vld [vmem:[%s2712_s4 + $0x80] sm:$0xff] }
  0xd9   : > { %v2025_v22 = vpack.c.bf16 %v1361_v20, %v1360_v3 }
  0xdb   : > { %2026 = vmatprep.subr.bf16.mxu0 %v2025_v22 }
  0xdd   : > { %1998 = vmatmul.mubr.msk.bf16.vlgmr.msra.gmra.mrb[32].mxu1 %vm288_vm1, %v2171_v15 }
  0xde   : > { %2002 = vmatpush3.bf16.msra.mxu1 %v1228_v18  ;;  %2003 = vmatprep.mubr.msk.bf16.mxu1 %vm2252_vm5, %v2251_v32 }
  0xdf   : > { %2058 = vmatprep.subr.bf16.mxu1 %v2057_v7 }
  0xe1   : > { %1876 = vmatmul.mubr.msk.bf16.vlgmr.msra.gmra.mrb[0].mxu0 %vm288_vm1, %v2172_v19 }
  0xe2   : > { %2028 = vmatpush3.bf16.msra.mxu0 %v2027_v24 }
  0xe3   : > { %2030 = vmatprep.subr.bf16.mxu0 %v2029_v27 }
  0xe5   : > { %2004 = vmatmul.mubr.msk.bf16.vlgmr.msra.gmra.mrb[36].mxu1 %vm288_vm1, %v2172_v19 }
  0xe6   : > { %2032 = vmatpush3.bf16.msra.mxu0 %v2031_v30  ;;  %2060 = vmatpush3.bf16.msra.mxu1 %v2057_v7 }
  0xe7   : > { %2034 = vmatprep.subr.bf16.mxu0 %v2033_v35  ;;  %2062 = vmatprep.subr.bf16.mxu1 %v2061_v11 }
  0xea   : > { %2036 = vmatpush3.bf16.msra.mxu0 %v2035_v37  ;;  %2064 = vmatpush3.bf16.msra.mxu1 %v2061_v11 }
  0xeb   : > { %2038 = vmatprep.subr.bf16.mxu0 %v2037_v40 }
  0xee   : > { %2040 = vmatpush3.bf16.msra.mxu0 %v2039_v43 }
  0xef   : > { %2042 = vmatprep.subr.bf16.mxu0 %v2041_v47 }
  0xf2   : > { %2044 = vmatpush3.bf16.msra.mxu0 %v2043_v49 }
  0xf3   : > { %2046 = vmatprep.subr.bf16.mxu0 %v2045_v52 }
  0xf6   : > { %2048 = vmatpush3.bf16.msra.mxu0 %v2047_v55 }
  0xf7   : > { %2050 = vmatprep.subr.bf16.mxu0 %v2049_v58 }
  0xfa   : > { %2052 = vmatpush3.bf16.msra.mxu0 %v2051_v61 }
  0xfb   : > { %2054 = vmatprep.subr.bf16.mxu0 %v2053_v1 }
  0xfe   : > { %2056 = vmatpush3.bf16.msra.mxu0 %v2055_v8 }
 0x170   : > { %v336_v12 = vpop.f32.mrb[0].mxu1 }
 0x171   : > { %v338_v13 = vpop.f32.mrb[1].mxu1 }
 0x172   : > { %v340_v14 = vpop.f32.mrb[2].mxu1 }
 0x173   : > { %v342_v15 = vpop.f32.mrb[3].mxu1 }
 0x178   : > { %v379_v16 = vpop.f32.mrb[4].mxu1 }
 0x179   : > { %v1957_v17 = vpop.f32.mrb[5].mxu1 }
 0x17a   : > { %v382_v18 = vpop.f32.mrb[6].mxu1 }
 0x17b   : > { %v1958_v19 = vpop.f32.mrb[7].mxu1 }
 0x180   : > { %v480_v3 = vpop.f32.mrb[8].mxu1 }
 0x181   : > { %v481_v20 = vadd.f32 %v480_v3, %v379_v16  ;;  %v1963_v21 = vpop.f32.mrb[9].mxu1 }
 0x182   : > { %v483_v22 = vpop.f32.mrb[10].mxu1 }
 0x183   : > { %v484_v23 = vadd.f32 %v483_v22, %v382_v18  ;;  %v1964_v24 = vpop.f32.mrb[11].mxu1 }
 0x188   : > { %v593_v25 = vpop.f32.mrb[12].mxu1 }
 0x189   : > { %v602_v26 = vadd.f32 %v593_v25, %v481_v20  ;;  %v1969_v27 = vpop.f32.mrb[13].mxu1 }
 0x18a   : > { %v596_v28 = vpop.f32.mrb[14].mxu1  ;;  %v1540_v27 = vld [vmem:[%s2713_s5 + $0x8] sm:$0xff] }
 0x18b   : > { %v605_v29 = vadd.f32 %v596_v28, %v484_v23  ;;  %v1970_v30 = vpop.f32.mrb[15].mxu1  ;;  %v1543_v28 = vld [vmem:[%s2713_s5 + $0x20] sm:$0xff] }
 0x18c   : > { %v2065_v30 = vpack.c.bf16 %v1543_v28, %v1540_v27 }
 0x18e   : > { %2066 = vmatprep.subr.bf16.mxu1 %v2065_v30 }
 0x190   : > { %v712_v31 = vpop.f32.mrb[16].mxu1 }
 0x191   : > { %v721_v33 = vadd.f32 %v712_v31, %v602_v26  ;;  %v1975_v34 = vpop.f32.mrb[17].mxu1  ;;  %v1542_v31 = vld [vmem:[%s2713_s5 + $0x18] sm:$0xff] }
 0x192   : > { %v715_v35 = vpop.f32.mrb[18].mxu1  ;;  %v1541_v34 = vld [vmem:[%s2713_s5 + $0x10] sm:$0xff] }
 0x193   : > { %v724_v36 = vadd.f32 %v715_v35, %v605_v29  ;;  %v1976_v37 = vpop.f32.mrb[19].mxu1  ;;  %v1539_v29 = vld [vmem:[%s2713_s5] sm:$0xff]  ;;  %v1544_v35 = vld [vmem:[%s2713_s5 + $0x28] sm:$0xff] }
 0x198   : > { %v831_v38 = vpop.f32.mrb[20].mxu1 }
 0x199   : > { %v840_v39 = vadd.f32 %v831_v38, %v721_v33  ;;  %v1981_v40 = vpop.f32.mrb[21].mxu1  ;;  %v2067_v33 = vpack.c.bf16 %v1542_v31, %v1539_v29 }
 0x19a   : > { %v834_v41 = vpop.f32.mrb[22].mxu1 }
 0x19b   : > { %v843_v42 = vadd.f32 %v834_v41, %v724_v36  ;;  %v1982_v43 = vpop.f32.mrb[23].mxu1  ;;  %v2069_v36 = vpack.c.bf16 %v1544_v35, %v1541_v34 }
 0x1a0   : > { %v950_v44 = vpop.f32.mrb[24].mxu1 }
 0x1a1   : > { %v959_v45 = vadd.f32 %v950_v44, %v840_v39  ;;  %v1987_v46 = vpop.f32.mrb[25].mxu1 }
 0x1a2   : > { %v953_v47 = vpop.f32.mrb[26].mxu1 }
 0x1a3   : > { %v962_v48 = vadd.f32 %v953_v47, %v843_v42  ;;  %v1988_v49 = vpop.f32.mrb[27].mxu1 }
 0x1a8   : > { %v1069_v50 = vpop.f32.mrb[28].mxu1 }
 0x1a9   : > { %v1078_v51 = vadd.f32 %v1069_v50, %v959_v45  ;;  %v1993_v52 = vpop.f32.mrb[29].mxu1 }
 0x1aa   : > { %v1072_v53 = vpop.f32.mrb[30].mxu1  ;;  %v1710_v52 = vld [vmem:[%s2711_s3] sm:$0x7] }
 0x1ab   : > { %v1081_v54 = vadd.f32 %v1072_v53, %v962_v48  ;;  %v1994_v55 = vpop.f32.mrb[31].mxu1  ;;  %v1718_v53 = vsub.s32 1, %v2343_v4 }
 0x1b0   : > { %v1188_v56 = vpop.f32.mrb[32].mxu1 }
 0x1b1   : > { %v1197_v57 = vadd.f32 %v1188_v56, %v1078_v51  ;;  %v1999_v58 = vpop.f32.mrb[33].mxu1  ;;  %v1714_v51 = vsub.s32 0, %v2343_v4  ;;  %v1719_v56 = vrot.slane %v1710_v52, %v1718_v53 }
 0x1b2   : > { %v1191_v59 = vpop.f32.mrb[34].mxu1 }
 0x1b3   : > { %v1200_v60 = vadd.f32 %v1191_v59, %v1081_v54  ;;  %v2000_v61 = vpop.f32.mrb[35].mxu1  ;;  %v1715_v54 = vrot.slane %v1710_v52, %v1714_v51 }
 0x1b4   : > { %v1264_v62 = vpop.f32.mrb[0].mxu0 }
 0x1b5   : > { %v2073_v0 = vadd.f32 %v1264_v62, %v336_v12  ;;  %v1266_v1 = vpop.f32.mrb[1].mxu0 }
 0x1b6   : > { %v2074_v2 = vadd.f32 %v1266_v1, %v338_v13  ;;  %v1268_v5 = vpop.f32.mrb[2].mxu0 }
 0x1b7   : > { %v2594_v6 = vadd.f32 %v2073_v0, %v1325_v63  ;;  %v2075_v7 = vadd.f32 %v1268_v5, %v340_v14  ;;  %v1270_v8 = vpop.f32.mrb[3].mxu0 }
 0x1b8   : > { %v2596_v10 = vadd.f32 %v2074_v2, %v1325_v63  ;;  %v2076_v11 = vadd.f32 %v1270_v8, %v342_v15  ;;  %v1307_v16 = vpop.f32.mrb[36].mxu1 }
 0x1b9   : > { %v1316_v17 = vadd.f32 %v1307_v16, %v1197_v57  ;;  %v2005_v18 = vpop.f32.mrb[37].mxu1  ;;  %v1338_v13 = vmul.f32 %v2594_v6, %v2594_v6  ;;  %v2604_v20 = vadd.f32 %v2075_v7, %v1330_v9 }
 0x1ba   : > { %v1339_v19 = vmul.f32 %v2596_v10, %v2596_v10  ;;  %v2600_v3 = vadd.f32 %v2076_v11, %v1330_v9  ;;  %v1310_v12 = vpop.f32.mrb[38].mxu1 }
 0x1bb   : > { %v2606_v14 = vadd.f32 %v1325_v63, %v1316_v17  ;;  %v1319_v21 = vadd.f32 %v1310_v12, %v1200_v60  ;;  %v2006_v22 = vpop.f32.mrb[39].mxu1  ;;  %v1341_v25 = vmul.f32 %v2604_v20, %v2604_v20  ;;  %v1722_v60 = vsub.s32 2, %v2343_v4 }
 0x1bc   : > { %v1342_v15 = vmul.f32 %v2600_v3, %v2600_v3  ;;  %1451 = vmatprep.mubr.f32.mxu0 %v1339_v19 }
 0x1bd   : > { %v1340_v23 = vmul.f32 %v2606_v14, %v2606_v14  ;;  %v2612_v24 = vadd.f32 %v1330_v9, %v1319_v21  ;;  %1452 = vmatmul.mubr.f32.vlgmr.msra.gmra.mrb[4].mxu0 %v1338_v13 }
 0x1be   : > { %1456 = vmatprep.mubr.f32.mxu0 %v1342_v15 }
 0x1bf   : > { %v1343_v26 = vmul.f32 %v2612_v24, %v2612_v24  ;;  %2015 = vmatprep.mubr.msk.f32.mxu1 %vm1380_vm11, %v1340_v23 }
 0x1c1   : > { %1457 = vmatmul.mubr.f32.gmra.mrb[6].mxu0 %v1341_v25  ;;  %2016 = vmatmul.mubr.msk.f32.vlgmr.msra.gmra.mrb[40].mxu1 %vm1380_vm11, %v1343_v26 }
 0x1c2   : > { %1616 = vmatprep.mubr.f32.mxu1 %v2251_v32  ;;  %2068 = vmatpush1.bf16.msra.mxu1 %v2067_v33 }
 0x1c3   : > { %2070 = vmatprep.subr.bf16.mxu1 %v2069_v36 }
 0x290   : > { %v1937_v37 = vpop.f32.mrb[4].mxu0 }
 0x291   : > { %v1938_v38 = vpop.f32.mrb[5].mxu0 }
 0x292   : > { %v1939_v39 = vadd.f32 %v1938_v38, %v1937_v37 }
 0x294   : > { %v1454_v40 = vadd.f32 1.1920929e-07, %v1939_v39  ;;  %v1940_v41 = vpop.f32.mrb[6].mxu0  ;;  %v2017_v42 = vpop.f32.mrb[40].mxu1 }
 0x295   : > { %v1941_v43 = vpop.f32.mrb[7].mxu0  ;;  %v1528_v44 = vpop.f32.mrb[41].mxu1 }
 0x296   : > { %v1942_v45 = vadd.f32 %v1941_v43, %v1940_v41  ;;  %v1529_v46 = vadd.f32 %v1528_v44, %v1454_v40 }
 0x298   : > { %v1459_v47 = vadd.f32 1.1920929e-07, %v1942_v45  ;;  %2173 = vrsqrt.f32 %v1529_v46 }
 0x29a   : > { %v1534_v48 = vadd.f32 %v2017_v42, %v1459_v47 }
 0x29c   : > { %2175 = vrsqrt.f32 %v1534_v48 }
 0x2a2   : > { %v2174_v49 = vpop.eup %2173 }
 0x2a3   : > { %1880 = vmatmul.mubr.msk.f32.vlgmr.msra.gmra.mrb[42].mxu1 %vm1545_vm12, %v2174_v49 }
 0x2a4   : > { %1622 = vmatprep.mubr.f32.mxu1 %v2251_v32  ;;  %2072 = vmatpush3.bf16.msra.mxu1 %v2069_v36 }
 0x2a6   : > { %v2176_v50 = vpop.eup %2175 }
 0x2a7   : > { %1881 = vmatmul.mubr.msk.f32.gmra.mrb[44].mxu1 %vm1545_vm12, %v2176_v50 }
 0x2a8   : > { %2022 = vmatprep.mubr.msk.f32.mxu1 %vm1545_vm12, %v2174_v49 }
 0x2ab   : > { %2023 = vmatmul.mubr.msk.f32.vlgmr.msra.gmra.mrb[46].mxu1 %vm1545_vm12, %v2176_v50 }
 0x376   : > { %v1618_v55 = vpop.f32.mrb[42].mxu1 }
 0x377   : > { %v1704_v32 = vmul.f32 %v1618_v55, %v2594_v6  ;;  %v1620_v57 = vpop.f32.mrb[43].mxu1  ;;  %v1723_v6 = vrot.slane %v1710_v52, %v1722_v60 }
 0x378   : > { %v1705_v58 = vmul.f32 %v1620_v57, %v2596_v10 }
 0x379   : > { %v1727_v59 = vmul.f32 %v1715_v54, %v1704_v32 }
 0x37a   : > { %v1728_v61 = vmul.f32 %v1719_v56, %v1705_v58  ;;  %v1624_v62 = vpop.f32.mrb[44].mxu1 }
 0x37b   : > { %v1733_v63 = vmax.f32 %v1727_v59, 0.0  ;;  %v1707_v0 = vmul.f32 %v1624_v62, %v2604_v20  ;;  %v1626_v1 = vpop.f32.mrb[45].mxu1 }
 0x37c   : > { %v1734_v2 = vmax.f32 %v1728_v61, 0.0  ;;  %v1708_v5 = vmul.f32 %v1626_v1, %v2600_v3 }
 0x37d   : > { %1739 = vst [vmem:[%s244_s12] sm:$0xff] %v1733_v63  ;;  %v1730_v7 = vmul.f32 %v1715_v54, %v1707_v0 }
 0x37e   : > { %1740 = vst [vmem:[%s244_s12 + $0x8] sm:$0xff] %v1734_v2  ;;  %v1731_v8 = vmul.f32 %v1719_v56, %v1708_v5  ;;  %v2024_v9 = vpop.f32.mrb[46].mxu1 }
 0x37f   : > { %v1736_v10 = vmax.f32 %v1730_v7, 0.0  ;;  %v1709_v4 = vmul.f32 %v2024_v9, %v2612_v24  ;;  %v1695_v11 = vpop.f32.mrb[47].mxu1 }
 0x380   : > { %v1737_v16 = vmax.f32 %v1731_v8, 0.0  ;;  %v1706_v17 = vmul.f32 %v1695_v11, %v2606_v14 }
 0x381   : > { %1742 = vst [vmem:[%s244_s12 + $0x18] sm:$0xff] %v1736_v10  ;;  %v1732_v18 = vmul.f32 %v1723_v6, %v1709_v4 }
 0x382   : > { %1743 = vst [vmem:[%s244_s12 + $0x20] sm:$0xff] %v1737_v16  ;;  %v1729_v19 = vmul.f32 %v1723_v6, %v1706_v17 }
 0x383   : > { %v1738_v3 = vmax.f32 %v1732_v18, 0.0 }
 0x384   : > { %v1735_v12 = vmax.f32 %v1729_v19, 0.0 }
 0x385   : > { %1744 = vst.msk [vmem:[%s244_s12 + $0x28] sm:$0xff] %vm1380_vm11, %v1738_v3 }
 0x386   : > { %1741 = vst.msk [vmem:[%s244_s12 + $0x10] sm:$0xff] %vm1380_vm11, %v1735_v12 }
 0x387   : > { %2190 = shalt.err (!%p2187_p3)
}
 0x388   : > { %s2191_s28 = scalar_lea.hbm %s2661_s17, 768  ;;  %s2195_s10 = scalar_lea.hbm %s2714_s6, 1536 }
 0x389   : > { %p2192_p4 = scmp.ne.s32.totalorder %s2661_s17, %s2191_s28  ;;  %p2196_p9 = scmp.lt.u32.totalorder %s2661_s17, %s2714_s6 }
 0x38a   : > { %p2197_p10 = scmp.lt.u32.totalorder %s2195_s10, %s2191_s28  ;;  %p2199_p12 = scmp.lt.u32.totalorder %s2191_s28, %s2661_s17 }
 0x38b   : > { %p2193_p7 = pnand %p2192_p4, %p2329_p5 }
 0x38c   : > { %p2198_p11 = por %p2197_p10, %p2196_p9 }
 0x38d   : > { %p2194_p8 = pneg %p2193_p7 }
 0x38e   : > { %p2200_p13 = por %p2199_p12, %p2198_p11 }
 0x390   : > { %p2201_p0 = pnand %p2200_p13, %p2194_p8 }
 0x392   : > { %2204 = shalt.err (!%p2201_p0)
}
 0x393   : > { %s2254_s14 = smov 384   ;;  %s2255_s15 = smov 24  }
 0x394   : > { %2108 = dma.vmem_to_hbm [thread:$0]  (%p2329_p5), %s2656_s13, 768, %s2661_s17, %s2667_s25, %s2254_s14, %s2254_s14, %s2255_s15  }
 0x395 PF: > { %p2114_p1 = scmp.ge.s32.totalorder %s2239_s24, 2  ;;  %s1774_s16 = sand.u32 1, %s2227_s21  }
 0x396   : > { %s1775_s18 = scalar_lea.sflag [#allocation3], %s1774_s16 }
 0x397   : > { %p2111_p2 = pnand %p2114_p1, %p2333_p6 }
 0x399   : > { %2222 = dma.done.wait (!%p2111_p2), %s1775_s18, 768  }
 0x39a   : > { %2224 = vsyncadd (!%p2111_p2), %s1775_s18, 4294966528  ;;  %p16_p3 = scmp.ge.s32.totalorder %s2316_s27, 4   ;;  %s2717_s21 = smov %s2231_s22 }
 0x39b   : > { %s2718_s22 = smov %s2235_s23  ;;  %s2719_s23 = smov %s2327_s30 }
 0x39c   : > { %s2720_s24 = smov %s2316_s27  ;;  %18 = sbr.rel (!%p16_p3) target bundleno = 3 (0x3), region = 87 }
 0x3a3   :  { %1780 = vsyncpa [#allocation3], 1 }
 0x3a4   :  { %1782 = vsyncpa [#allocation3 + $0x1], 1 }

</bundles_post_ra>
